<compile_context>
chip_gen: v6e
topology: v6e:2x2x1
jax: 0.10.0
libtpu: 0.0.40
codegen_flags: <defaults>
</compile_context>

<pallas_src>
import functools

import jax
import jax.numpy as jnp
from jax.experimental import pallas as pl
from jax.experimental.pallas import tpu as pltpu

LANE = 128      # vreg lane width  -> last-dim tiling unit
SUBLANE = 8     # vreg sublane cnt -> second-minor tiling unit


def _round_up(x: int, m: int) -> int:
    return ((x + m - 1) // m) * m


def _pad_to(a, shape):
    pads = tuple((0, t - s) for s, t in zip(a.shape, shape))
    if any(p for _, p in pads):
        a = jnp.pad(a, pads)
    return a


@functools.lru_cache(maxsize=1)
def _vmem_capacity_bytes() -> int:
    """Per-core VMEM capacity; falls back to the most conservative (v7x) value."""
    try:
        cap = int(pltpu.get_tpu_info().vmem_capacity_bytes)
        if cap > 0:
            return cap
    except Exception:  # older jax / attribute rename: be conservative
        pass
    return 64 << 20


@functools.lru_cache(maxsize=1)
def _buffered_single_supported() -> bool:
    """Narrow feature probe: does this jax/Mosaic accept pipeline_mode=pl.Buffered(1)?

    Probing a trivial kernel keeps failures of the *real* kernel fully visible (no
    blanket try/except around the production pallas_call).
    """
    if not hasattr(pl, "Buffered"):
        return False

    def probe(x_ref, o_ref):
        o_ref[...] = x_ref[...] + 1.0

    try:
        fn = pl.pallas_call(
            probe,
            out_shape=jax.ShapeDtypeStruct((8, 128), jnp.float32),
            grid=(2,),
            in_specs=[pl.BlockSpec((8, 128), lambda i: (0, 0),
                                   pipeline_mode=pl.Buffered(1))],
            out_specs=pl.BlockSpec((8, 128), lambda i: (0, 0)),
        )
        jax.jit(fn).lower(jnp.zeros((8, 128), jnp.float32)).compile()
        return True
    except Exception:
        return False


def _rwkv_ffn_kernel(x_ref, halo_ref, tmk_ref, tmr_ref, wk_ref, wv_ref, wr_ref,
                     o_ref, kv_acc):
    # x_ref:    (1, TQ, Cp)   native dtype  -- one sequence tile of one batch element
    # halo_ref: (1, 1, 1, Cp) native dtype  -- last row of the previous tile (zeros at t==0)
    # tm*_ref:  (1, Cp) f32
    # wk_ref:   (Cp, TF) bf16; wv_ref: (TF, Cp) bf16; wr_ref: (Cp, Cp) bf16
    # o_ref:    (1, TQ, Cp)   ; kv_acc: (TQ, Cp) f32 scratch accumulator over F-slices
    j = pl.program_id(2)
    nj = pl.num_programs(2)

    x = x_ref[0].astype(jnp.float32)                           # (TQ, Cp)
    tq = x.shape[0]

    # time shift inside the tile: shifted[t] = x[t-1]; row 0 comes from the halo.
    rolled = pltpu.roll(x, shift=1, axis=0)
    row = jax.lax.broadcasted_iota(jnp.int32, (tq, 1), 0)      # cheap (TQ, 1) mask
    shifted = jnp.where(row == 0, halo_ref[0, 0].astype(jnp.float32), rolled)

    # Key branch for this F-slice: bf16 MXU matmuls, f32 accumulation / epilogue.
    tmk = tmk_ref[...]                                         # (1, Cp), broadcasts over TQ
    xk = x * tmk + shifted * (1.0 - tmk)
    k = jnp.dot(xk.astype(jnp.bfloat16), wk_ref[...],
                preferred_element_type=jnp.float32)            # (TQ, TF)
    k = jnp.square(jnp.maximum(k, 0.0))
    kv_part = jnp.dot(k.astype(jnp.bfloat16), wv_ref[...],
                      preferred_element_type=jnp.float32)      # (TQ, Cp)

    @pl.when(j == 0)
    def _():
        kv_acc[...] = kv_part

    @pl.when(j > 0)
    def _():
        kv_acc[...] += kv_part

    # Receptance branch + epilogue only once per (b, t) tile, after kv is complete.
    @pl.when(j == nj - 1)
    def _():
        tmr = tmr_ref[...]
        xr = x * tmr + shifted * (1.0 - tmr)
        r = jax.nn.sigmoid(jnp.dot(xr.astype(jnp.bfloat16), wr_ref[...],
                                   preferred_element_type=jnp.float32))
        o_ref[0] = (r * kv_acc[...]).astype(o_ref.dtype)


def _vmem_bytes_estimate(tq, cp, tf, x_bytes, out_bytes, single_buf):
    """Rough per-step VMEM footprint (bytes), including bf16 cast temporaries."""
    wbuf = 1 if single_buf else 2
    weights = cp * cp * 2 * wbuf                  # receptance (resident)
    weights += 2 * (cp * tf + tf * cp) * 2        # key/value F-slices, double-buffered bf16
    small = 2 * 2 * cp * 4 * wbuf                 # time-mix vectors
    small += 2 * cp * x_bytes                     # halo row
    io = 2 * tq * cp * (x_bytes + out_bytes)      # x + out tiles, double-buffered
    acc = tq * cp * 4                             # kv accumulator scratch
    temps = 6 * tq * cp * 4                       # x/shifted/xk/xr/r/kv f32 temps
    temps += 2 * tq * cp * 2 + tq * tf * 2        # bf16 casts of xk/xr and k
    temps += tq * tf * 4                          # k (f32)
    return int(1.15 * (weights + small + io + acc + temps)) + (2 << 20)


def _choose_tiling(B, T, C, F_dim, x_bytes, out_bytes, vmem_budget, single_buf):
    cp = _round_up(C, LANE)
    fp_min = _round_up(F_dim, LANE)
    t8 = _round_up(T, SUBLANE)

    # Bigger sequence tiles on big-VMEM parts (v5e/v6e: 128 MiB), smaller on v7x (64 MiB).
    tq_prefs = (512, 256, 128) if vmem_budget >= (80 << 20) else (256, 128)
    tq_cands = sorted({min(t, t8) for t in tq_prefs}, reverse=True)
    tf_cands = sorted({min(c, fp_min)
                       for c in (8192, 4096, 2048, 1024, 512, 256, 128)}, reverse=True)

    tq, tf = tq_cands[-1], tf_cands[-1]           # fallback: smallest candidate tiles
    found = False
    for tq_c in tq_cands:
        for tf_c in tf_cands:
            if _vmem_bytes_estimate(tq_c, cp, tf_c, x_bytes, out_bytes,
                                    single_buf) <= vmem_budget:
                tq, tf, found = tq_c, tf_c, True
                break
        if found:
            break

    # Give the parallel (batch, seq-tile) grid at least 2 steps when the sequence allows
    # it, so both TensorCores on dual-core parts (v7x) get work.
    while B * (-(-T // tq)) < 2 and tq > 128 and T > 128:
        tq = max(128, _round_up(tq // 2, SUBLANE))

    fp = _round_up(F_dim, tf)
    return tq, tf, cp, fp


@functools.partial(
    jax.jit,
    static_argnames=("tq", "tf", "cp", "fp", "vmem_limit", "single_buf"))
def _rwkv_feed_forward_impl(x, time_mix_k, time_mix_r, w_key, w_receptance, w_value,
                            *, tq, tf, cp, fp, vmem_limit, single_buf):
    B, T, C = x.shape
    out_dtype = x.dtype

    num_t = -(-T // tq)
    t_pad = num_t * tq
    n_f = fp // tf

    # Zero-pad to lane/sublane-dense shapes (semantically inert for this op).
    x_p = _pad_to(x, (B, t_pad, cp))

    # Halo row per (batch, tile): previous tile's last row; zeros at the sequence start.
    if num_t > 1:
        halo = jnp.concatenate(
            [jnp.zeros((B, 1, cp), x_p.dtype), x_p[:, tq - 1:t_pad - 1:tq, :]], axis=1)
    else:
        halo = jnp.zeros((B, 1, cp), x_p.dtype)
    halo = halo.reshape(B, num_t, 1, cp)

    tmk = _pad_to(jnp.reshape(time_mix_k, (1, -1)).astype(jnp.float32), (1, cp))
    tmr = _pad_to(jnp.reshape(time_mix_r, (1, -1)).astype(jnp.float32), (1, cp))
    # bf16 weights for the MXU (no-op casts if the caller already passes bf16 weights).
    wk = _pad_to(w_key.astype(jnp.bfloat16), (cp, fp))
    wr = _pad_to(w_receptance.astype(jnp.bfloat16), (cp, cp))
    wv = _pad_to(w_value.astype(jnp.bfloat16), (fp, cp))

    # Single-buffer only the truly invariant inputs; per-j weight slices keep the
    # default double buffering so their DMA hides under the previous slice's matmul.
    inv_kwargs = {"pipeline_mode": pl.Buffered(1)} if single_buf else {}

    out_p = pl.pallas_call(
        _rwkv_ffn_kernel,
        out_shape=jax.ShapeDtypeStruct((B, t_pad, cp), out_dtype),
        grid_spec=pltpu.PrefetchScalarGridSpec(
            num_scalar_prefetch=0,
            grid=(B, num_t, n_f),
            in_specs=[
                pl.BlockSpec((1, tq, cp), lambda b, t, j: (b, t, 0)),          # x tile
                pl.BlockSpec((1, 1, 1, cp), lambda b, t, j: (b, t, 0, 0)),     # halo row
                pl.BlockSpec((1, cp), lambda b, t, j: (0, 0), **inv_kwargs),   # time_mix_k
                pl.BlockSpec((1, cp), lambda b, t, j: (0, 0), **inv_kwargs),   # time_mix_r
                pl.BlockSpec((cp, tf), lambda b, t, j: (0, j)),                # key W slice
                pl.BlockSpec((tf, cp), lambda b, t, j: (j, 0)),                # value W slice
                pl.BlockSpec((cp, cp), lambda b, t, j: (0, 0), **inv_kwargs),  # receptance W
            ],
            out_specs=pl.BlockSpec((1, tq, cp), lambda b, t, j: (b, t, 0)),
            scratch_shapes=[pltpu.VMEM((tq, cp), jnp.float32)],                # kv accumulator
        ),
        compiler_params=pltpu.CompilerParams(
            dimension_semantics=("parallel", "parallel", "arbitrary"),
            vmem_limit_bytes=vmem_limit,
        ),
    )(x_p, halo, tmk, tmr, wk, wv, wr)

    if (t_pad, cp) != (T, C):
        out_p = out_p[:, :T, :C]
    return out_p


def rwkv_feed_forward(x, time_mix_k, time_mix_r, w_key, w_receptance, w_value,
                      *, tile_t=None, tile_f=None):
    """state=None forward path of RwkvFeedForward.

    x: (B, T, C); time_mix_*: (1, C) or (1, 1, C); weights pre-transposed:
    w_key (C, dim_ffn), w_receptance (C, C), w_value (dim_ffn, C).
    Pass bf16 weights (cast once, outside the per-call path) to avoid re-casting.
    """
    B, T, C = x.shape
    F_dim = w_key.shape[1]

    # Generation-aware VMEM budget: ~0.82 x per-core capacity, capped for safety.
    vmem_budget = min(int(0.82 * _vmem_capacity_bytes()), 110 << 20)
    single_buf = _buffered_single_supported()
    x_bytes = jnp.dtype(x.dtype).itemsize

    tq, tf, cp, fp = _choose_tiling(B, T, C, F_dim, x_bytes, x_bytes,
                                    vmem_budget, single_buf)
    if tile_t is not None:  # test / tuning override
        tq = min(_round_up(tile_t, SUBLANE), _round_up(T, SUBLANE))
    if tile_f is not None:  # test / tuning override
        tf = min(_round_up(tile_f, LANE), _round_up(F_dim, LANE))
        fp = _round_up(F_dim, tf)

    return _rwkv_feed_forward_impl(
        x, time_mix_k, time_mix_r, w_key, w_receptance, w_value,
        tq=tq, tf=tf, cp=cp, fp=fp, vmem_limit=vmem_budget, single_buf=single_buf)


def _reference(x, time_mix_k, time_mix_r, w_key, w_receptance, w_value):
    x = x.astype(jnp.float32)
    tmk = jnp.reshape(time_mix_k, (1, 1, -1)).astype(jnp.float32)
    tmr = jnp.reshape(time_mix_r, (1, 1, -1)).astype(jnp.float32)
    wk = w_key.astype(jnp.float32)
    wr = w_receptance.astype(jnp.float32)
    wv = w_value.astype(jnp.float32)
    shifted = jnp.concatenate([jnp.zeros_like(x[:, :1]), x[:, :-1]], axis=1)
    xk = x * tmk + shifted * (1.0 - tmk)
    xr = x * tmr + shifted * (1.0 - tmr)
    k = jnp.square(jnp.maximum(xk @ wk, 0.0))
    kv = k @ wv
    return jax.nn.sigmoid(xr @ wr) * kv


if __name__ == "__main__":
    def make_inputs(key, B, T, C, F_dim, x_dtype=jnp.float32):
        k0, k1, k2, k3, k4, k5 = jax.random.split(key, 6)
        x = jax.random.normal(k0, (B, T, C), dtype=x_dtype)
        time_mix_k = jax.random.uniform(k1, (1, C), dtype=jnp.float32)          # torch: (1,1,C)
        time_mix_r = jax.random.uniform(k2, (1, C), dtype=jnp.float32)          # torch: (1,1,C)
        w_key = jax.random.normal(k3, (C, F_dim), dtype=jnp.float32) * 0.05     # key.weight.T
        w_receptance = jax.random.normal(k4, (C, C), dtype=jnp.float32) * 0.05  # receptance.weight.T
        w_value = jax.random.normal(k5, (F_dim, C), dtype=jnp.float32) * 0.05   # value.weight.T
        return x, time_mix_k, time_mix_r, w_key, w_receptance, w_value

    # 1) Small shapes consistent with the module: batch=2, seq=8, n_embd=32, dim_ffn=128.
    args_small = make_inputs(jax.random.PRNGKey(0), B=2, T=8, C=32, F_dim=128)
    out = jax.block_until_ready(rwkv_feed_forward(*args_small))
    ref = _reference(*args_small)
    assert out.shape == (2, 8, 32)
    assert jnp.allclose(out, ref, atol=2e-2, rtol=2e-2), "mismatch vs reference (small)"

    # 2) Multi-tile halo + F-tiled kv accumulator path (forced small tiles).
    args_tiled = make_inputs(jax.random.PRNGKey(1), B=1, T=512, C=128, F_dim=256)
    out2 = jax.block_until_ready(rwkv_feed_forward(*args_tiled, tile_t=128, tile_f=128))
    ref2 = _reference(*args_tiled)
    assert out2.shape == (1, 512, 128)
    assert jnp.allclose(out2, ref2, atol=2e-2, rtol=2e-2), "mismatch vs reference (tiled)"

    # 3) Native-bf16 activations + persisted bf16 weights + C/F/T padding path.
    x3, tmk3, tmr3, wk3, wr3, wv3 = make_inputs(
        jax.random.PRNGKey(2), B=2, T=50, C=100, F_dim=192, x_dtype=jnp.bfloat16)
    wk3, wr3, wv3 = (w.astype(jnp.bfloat16) for w in (wk3, wr3, wv3))  # cast once, reuse
    out3 = jax.block_until_ready(rwkv_feed_forward(x3, tmk3, tmr3, wk3, wr3, wv3))
    ref3 = _reference(x3, tmk3, tmr3, wk3, wr3, wv3)
    assert out3.shape == (2, 50, 100)
    assert jnp.allclose(out3.astype(jnp.float32), ref3, atol=3e-2, rtol=3e-2), \
        "mismatch vs reference (padded/bf16)"

    print("KERNEL_OK")
</pallas_src>

<mosaic_0001>
module attributes {stable_mosaic.version = 11 : i64} {
  func.func @_rwkv_ffn_kernel(%arg0: i32, %arg1: i32, %arg2: i32, %arg3: memref<1x8x128xf32, #tpu.memory_space<vmem>>, %arg4: memref<1x1x1x128xf32, #tpu.memory_space<vmem>>, %arg5: memref<1x128xf32, #tpu.memory_space<vmem>>, %arg6: memref<1x128xf32, #tpu.memory_space<vmem>>, %arg7: memref<128x128xbf16, #tpu.memory_space<vmem>>, %arg8: memref<128x128xbf16, #tpu.memory_space<vmem>>, %arg9: memref<128x128xbf16, #tpu.memory_space<vmem>>, %arg10: memref<1x8x128xf32, #tpu.memory_space<vmem>>, %arg11: memref<8x128xf32, #tpu.memory_space<vmem>>) attributes {dimension_semantics = [#tpu.dimension_semantics<parallel>, #tpu.dimension_semantics<parallel>, #tpu.dimension_semantics<arbitrary>], iteration_bounds = array<i64: 2, 1, 1>, scalar_prefetch = 0 : i64, scratch_operands = 1 : i64, tpu.core_type = #tpu.core_type<tc>, window_params = [{transform_indices = @transform_0, window_bounds = array<i64: 1, 8, 128>}, {transform_indices = @transform_1, window_bounds = array<i64: 1, 1, 1, 128>}, {pipeline_mode = #tpu.pipeline_mode<synchronous>, transform_indices = @transform_2, window_bounds = array<i64: 1, 128>}, {pipeline_mode = #tpu.pipeline_mode<synchronous>, transform_indices = @transform_3, window_bounds = array<i64: 1, 128>}, {transform_indices = @transform_4, window_bounds = array<i64: 128, 128>}, {transform_indices = @transform_5, window_bounds = array<i64: 128, 128>}, {pipeline_mode = #tpu.pipeline_mode<synchronous>, transform_indices = @transform_6, window_bounds = array<i64: 128, 128>}, {transform_indices = @transform_7, window_bounds = array<i64: 1, 8, 128>}]} {
    %c0 = arith.constant 0 : index
    %c0_0 = arith.constant 0 : index
    %c0_1 = arith.constant 0 : index
    %0 = vector.load %arg3[%c0, %c0_0, %c0_1] : memref<1x8x128xf32, #tpu.memory_space<vmem>>, vector<1x8x128xf32>
    %1 = vector.shape_cast %0 : vector<1x8x128xf32> to vector<8x128xf32>
    %c1_i32 = arith.constant 1 : i32
    %2 = tpu.dynamic_rotate %1 by %c1_i32 dim 0 : vector<8x128xf32>, i32 -> vector<8x128xf32>
    %3 = tpu.iota {dimensions = array<i32: 0>} : vector<8x1xi32>
    %c0_i32 = arith.constant 0 : i32
    %4 = vector.broadcast %c0_i32 : i32 to vector<8x1xi32>
    %5 = arith.cmpi eq, %3, %4 : vector<8x1xi32>
    %c0_2 = arith.constant 0 : index
    %c0_3 = arith.constant 0 : index
    %c0_4 = arith.constant 0 : index
    %c0_5 = arith.constant 0 : index
    %6 = vector.load %arg4[%c0_2, %c0_3, %c0_4, %c0_5] : memref<1x1x1x128xf32, #tpu.memory_space<vmem>>, vector<1x1x1x128xf32>
    %7 = vector.shape_cast %6 : vector<1x1x1x128xf32> to vector<1x128xf32>
    %8 = vector.shape_cast %5 : vector<8x1xi1> to vector<8x1xi1>
    %9 = vector.broadcast %8 : vector<8x1xi1> to vector<8x128xi1>
    %10 = vector.shape_cast %7 : vector<1x128xf32> to vector<1x128xf32>
    %11 = vector.broadcast %10 : vector<1x128xf32> to vector<8x128xf32>
    %12 = arith.select %9, %11, %2 : vector<8x128xi1>, vector<8x128xf32>
    %c0_6 = arith.constant 0 : index
    %c0_7 = arith.constant 0 : index
    %13 = vector.load %arg5[%c0_6, %c0_7] : memref<1x128xf32, #tpu.memory_space<vmem>>, vector<1x128xf32>
    %14 = vector.broadcast %13 : vector<1x128xf32> to vector<8x128xf32>
    %15 = arith.mulf %1, %14 : vector<8x128xf32>
    %cst = arith.constant 1.000000e+00 : f32
    %16 = vector.broadcast %cst : f32 to vector<1x128xf32>
    %17 = arith.subf %16, %13 : vector<1x128xf32>
    %18 = vector.broadcast %17 : vector<1x128xf32> to vector<8x128xf32>
    %19 = arith.mulf %12, %18 : vector<8x128xf32>
    %20 = arith.addf %15, %19 : vector<8x128xf32>
    %21 = arith.truncf %20 : vector<8x128xf32> to vector<8x128xbf16>
    %c0_8 = arith.constant 0 : index
    %c0_9 = arith.constant 0 : index
    %22 = vector.load %arg7[%c0_8, %c0_9] : memref<128x128xbf16, #tpu.memory_space<vmem>>, vector<128x128xbf16>
    %cst_10 = arith.constant dense<0.000000e+00> : vector<8x128xf32>
    %23 = tpu.matmul %21, %22, %cst_10 {dimension_numbers = #tpu.dot_dimension_numbers<[1], [0], [0], [1], [0, 0, 1, 1], [], []>} : vector<8x128xbf16>, vector<128x128xbf16>, vector<8x128xf32> -> vector<8x128xf32>
    %cst_11 = arith.constant 0.000000e+00 : f32
    %24 = vector.broadcast %cst_11 : f32 to vector<8x128xf32>
    %25 = arith.maximumf %23, %24 : vector<8x128xf32>
    %26 = arith.mulf %25, %25 : vector<8x128xf32>
    %27 = arith.truncf %26 : vector<8x128xf32> to vector<8x128xbf16>
    %c0_12 = arith.constant 0 : index
    %c0_13 = arith.constant 0 : index
    %28 = vector.load %arg8[%c0_12, %c0_13] : memref<128x128xbf16, #tpu.memory_space<vmem>>, vector<128x128xbf16>
    %cst_14 = arith.constant dense<0.000000e+00> : vector<8x128xf32>
    %29 = tpu.matmul %27, %28, %cst_14 {dimension_numbers = #tpu.dot_dimension_numbers<[1], [0], [0], [1], [0, 0, 1, 1], [], []>} : vector<8x128xbf16>, vector<128x128xbf16>, vector<8x128xf32> -> vector<8x128xf32>
    %c0_i32_15 = arith.constant 0 : i32
    %30 = arith.cmpi eq, %arg2, %c0_i32_15 : i32
    %31 = arith.extui %30 : i1 to i32
    %c0_i32_16 = arith.constant 0 : i32
    %32 = arith.cmpi ne, %31, %c0_i32_16 : i32
    scf.if %32 {
      %c0_21 = arith.constant 0 : index
      %c0_22 = arith.constant 0 : index
      %39 = vector.load %arg11[%c0_21, %c0_22] : memref<8x128xf32, #tpu.memory_space<vmem>>, vector<8x128xf32>
      tpu.vector_store %arg11[%c0_21, %c0_22], %29 {strides = array<i32>} : memref<8x128xf32, #tpu.memory_space<vmem>>, vector<8x128xf32>,
    } else {
    }
    %c0_i32_17 = arith.constant 0 : i32
    %33 = arith.cmpi sgt, %arg2, %c0_i32_17 : i32
    %34 = arith.extui %33 : i1 to i32
    %c0_i32_18 = arith.constant 0 : i32
    %35 = arith.cmpi ne, %34, %c0_i32_18 : i32
    scf.if %35 {
      %c0_21 = arith.constant 0 : index
      %c0_22 = arith.constant 0 : index
      %39 = vector.load %arg11[%c0_21, %c0_22] : memref<8x128xf32, #tpu.memory_space<vmem>>, vector<8x128xf32>
      %40 = arith.addf %39, %29 : vector<8x128xf32>
      %c0_23 = arith.constant 0 : index
      %c0_24 = arith.constant 0 : index
      %41 = vector.load %arg11[%c0_23, %c0_24] : memref<8x128xf32, #tpu.memory_space<vmem>>, vector<8x128xf32>
      tpu.vector_store %arg11[%c0_23, %c0_24], %40 {strides = array<i32>} : memref<8x128xf32, #tpu.memory_space<vmem>>, vector<8x128xf32>,
    } else {
    }
    %c0_i32_19 = arith.constant 0 : i32
    %36 = arith.cmpi eq, %arg2, %c0_i32_19 : i32
    %37 = arith.extui %36 : i1 to i32
    %c0_i32_20 = arith.constant 0 : i32
    %38 = arith.cmpi ne, %37, %c0_i32_20 : i32
    scf.if %38 {
      %c0_21 = arith.constant 0 : index
      %c0_22 = arith.constant 0 : index
      %39 = vector.load %arg6[%c0_21, %c0_22] : memref<1x128xf32, #tpu.memory_space<vmem>>, vector<1x128xf32>
      %40 = vector.broadcast %39 : vector<1x128xf32> to vector<8x128xf32>
      %41 = arith.mulf %1, %40 : vector<8x128xf32>
      %cst_23 = arith.constant 1.000000e+00 : f32
      %42 = vector.broadcast %cst_23 : f32 to vector<1x128xf32>
      %43 = arith.subf %42, %39 : vector<1x128xf32>
      %44 = vector.broadcast %43 : vector<1x128xf32> to vector<8x128xf32>
      %45 = arith.mulf %12, %44 : vector<8x128xf32>
      %46 = arith.addf %41, %45 : vector<8x128xf32>
      %47 = arith.truncf %46 : vector<8x128xf32> to vector<8x128xbf16>
      %c0_24 = arith.constant 0 : index
      %c0_25 = arith.constant 0 : index
      %48 = vector.load %arg9[%c0_24, %c0_25] : memref<128x128xbf16, #tpu.memory_space<vmem>>, vector<128x128xbf16>
      %cst_26 = arith.constant dense<0.000000e+00> : vector<8x128xf32>
      %49 = tpu.matmul %47, %48, %cst_26 {dimension_numbers = #tpu.dot_dimension_numbers<[1], [0], [0], [1], [0, 0, 1, 1], [], []>} : vector<8x128xbf16>, vector<128x128xbf16>, vector<8x128xf32> -> vector<8x128xf32>
      %50 = arith.negf %49 : vector<8x128xf32>
      %51 = math.exp %50 : vector<8x128xf32>
      %cst_27 = arith.constant 1.000000e+00 : f32
      %52 = vector.broadcast %cst_27 : f32 to vector<8x128xf32>
      %53 = arith.addf %52, %51 : vector<8x128xf32>
      %54 = arith.divf %52, %53 : vector<8x128xf32>
      %c0_28 = arith.constant 0 : index
      %c0_29 = arith.constant 0 : index
      %55 = vector.load %arg11[%c0_28, %c0_29] : memref<8x128xf32, #tpu.memory_space<vmem>>, vector<8x128xf32>
      %56 = arith.mulf %54, %55 : vector<8x128xf32>
      %c0_30 = arith.constant 0 : index
      %c0_31 = arith.constant 0 : index
      %c0_32 = arith.constant 0 : index
      %57 = vector.load %arg10[%c0_30, %c0_31, %c0_32] : memref<1x8x128xf32, #tpu.memory_space<vmem>>, vector<1x8x128xf32>
      %58 = vector.shape_cast %57 : vector<1x8x128xf32> to vector<8x128xf32>
      %59 = vector.shape_cast %56 : vector<8x128xf32> to vector<1x8x128xf32>
      tpu.vector_store %arg10[%c0_30, %c0_31, %c0_32], %59 {strides = array<i32>} : memref<1x8x128xf32, #tpu.memory_space<vmem>>, vector<1x8x128xf32>,
    } else {
    }
    return
  }
  func.func @transform_0(%arg0: i32, %arg1: i32, %arg2: i32) -> (i32, i32, i32) {
    %c0_i32 = arith.constant 0 : i32
    %c0_i32_0 = arith.constant 0 : i32
    return %arg0, %arg1, %c0_i32 : i32, i32, i32
  }
  func.func @transform_1(%arg0: i32, %arg1: i32, %arg2: i32) -> (i32, i32, i32, i32) {
    %c0_i32 = arith.constant 0 : i32
    %c0_i32_0 = arith.constant 0 : i32
    %c0_i32_1 = arith.constant 0 : i32
    return %arg0, %arg1, %c0_i32, %c0_i32_0 : i32, i32, i32, i32
  }
  func.func @transform_2(%arg0: i32, %arg1: i32, %arg2: i32) -> (i32, i32) {
    %c0_i32 = arith.constant 0 : i32
    %c0_i32_0 = arith.constant 0 : i32
    %c0_i32_1 = arith.constant 0 : i32
    return %c0_i32, %c0_i32_0 : i32, i32
  }
  func.func @transform_3(%arg0: i32, %arg1: i32, %arg2: i32) -> (i32, i32) {
    %c0_i32 = arith.constant 0 : i32
    %c0_i32_0 = arith.constant 0 : i32
    %c0_i32_1 = arith.constant 0 : i32
    return %c0_i32, %c0_i32_0 : i32, i32
  }
  func.func @transform_4(%arg0: i32, %arg1: i32, %arg2: i32) -> (i32, i32) {
    %c0_i32 = arith.constant 0 : i32
    %c0_i32_0 = arith.constant 0 : i32
    return %c0_i32, %arg2 : i32, i32
  }
  func.func @transform_5(%arg0: i32, %arg1: i32, %arg2: i32) -> (i32, i32) {
    %c0_i32 = arith.constant 0 : i32
    %c0_i32_0 = arith.constant 0 : i32
    return %arg2, %c0_i32 : i32, i32
  }
  func.func @transform_6(%arg0: i32, %arg1: i32, %arg2: i32) -> (i32, i32) {
    %c0_i32 = arith.constant 0 : i32
    %c0_i32_0 = arith.constant 0 : i32
    %c0_i32_1 = arith.constant 0 : i32
    return %c0_i32, %c0_i32_0 : i32, i32
  }
  func.func @transform_7(%arg0: i32, %arg1: i32, %arg2: i32) -> (i32, i32, i32) {
    %c0_i32 = arith.constant 0 : i32
    %c0_i32_0 = arith.constant 0 : i32
    return %arg0, %arg1, %c0_i32 : i32, i32, i32
  }
}

</mosaic_0001>

<bundles_post_ra>
// kernel: _rwkv_feed_forward_impl.1
= control target key start
LH: loop header
LB: loop body
LE: loop exit
PB: predicated region body
PF: predicated region fallthrough
CT: control target
= control target key end

     0   :  { %12 = vsyncpa [#allocation4], 0  ;;  %s1457_s0 = inlined_call_operand.vmem [shape: f32[2,8,128], index: 0, kind: input, shape index: {}]   ;;  %s1458_s1 = inlined_call_operand.vmem [shape: f32[2,1,1,128], index: 1, kind: input, shape index: {}]   ;;  %s1459_s2 = inlined_call_operand.vmem [shape: f32[1,128], index: 2, kind: input, shape index: {}]   ;;  %s1460_s3 = inlined_call_operand.vmem [shape: f32[1,128], index: 3, kind: input, shape index: {}]   ;;  %s1461_s4 = inlined_call_operand.vmem [shape: bf16[128,128], index: 4, kind: input, shape index: {}]   ;;  %s1462_s5 = inlined_call_operand.vmem [shape: bf16[128,128], index: 5, kind: input, shape index: {}]   ;;  %s1463_s6 = inlined_call_operand.vmem [shape: bf16[128,128], index: 6, kind: input, shape index: {}]   ;;  %s1464_s7 = inlined_call_operand.hbm [shape: f32[2,8,128], index: 7, kind: output, shape index: {}]  }
   0x1   :  { %14 = vsyncpa [#allocation4 + $0x1], 0  ;;  %s1224_s24 = smov 0   ;;  %s1226_s25 = smov 0  }
   0x2   :  { %s1228_s26 = smov 0   ;;  %s1230_s27 = smov 0  }
   0x3   :  { %s1232_s28 = smov 0   ;;  %s1234_s29 = smov 0  }
   0x4 LB: > { %s892_s30 = sadd.s32 4294967295, %s1179_s29   ;;  %s893_s8 = sadd.s32 4294967294, %s1179_s29   ;;  %s1179_s29 = sphi %s1234_s29, %s20_s29   ;;  %s1175_s28 = sphi %s1232_s28, %s1471_s28   ;;  %s1171_s27 = sphi %s1230_s27, %s1470_s27   ;;  %s1167_s26 = sphi %s1228_s26, %s1469_s26   ;;  %s1163_s25 = sphi %s1226_s25, %s1468_s25   ;;  %s1159_s24 = sphi %s1224_s24, %s1467_s24  }
   0x5   : > { %s39_s9 = sadd.s32 1, %s1175_s28  ;;  %s219_s10 = sadd.s32 1, %s1167_s26 }
   0x6   : > { %p41_p0 = scmp.ge.s32.totalorder %s39_s9, 2  ;;  %p229_p1 = scmp.ne.s32.totalorder %s1167_s26, %s1163_s25 }
   0x7   : > { %p230_p2 = scmp.eq.s32.totalorder %s892_s30, 1  ;;  %p235_p3 = scmp.ne.s32.totalorder %s1163_s25, %s1159_s24 }
   0x8   : > { %s1473_s9 = smov (%p41_p0, %s39_s9), 0  ;;  %p236_p5 = scmp.eq.s32.totalorder %s893_s8, 1 }
   0x9   : > { %p1264_p4 = por %p230_p2, %p229_p1  ;;  %s214_s12 = ssub.s32 %s1175_s28, %s1473_s9 }
   0xa   : > { %p898_p6 = scmp.ge.s32.totalorder %s1179_s29, 1  ;;  %p217_p7 = scmp.eq.s32.totalorder %s214_s12, 0 }
   0xb   : > { %p1271_p8 = por %p236_p5, %p235_p3  ;;  %p298_p9 = scmp.lt.s32.totalorder %s1179_s29, 3 }
   0xc   : > { %s1277_s14 = scalar_select %p217_p7, %s1167_s26, %s219_s10  }
   0xd   : > { %p299_p10 = pnand %p898_p6, %p298_p9 }
   0xe   : > { %p347_p11 = scmp.lt.s32.totalorder (!%p299_p10), %s1171_s27, 1  ;;  %s344_s30 = sand.u32 (!%p299_p10), 1, %s1163_s25  }
   0xf   : > { %302 = sbr.rel (%p299_p10) target bundleno = 461 (0x1cd), region = 48  ;;  %s762_s18 = scalar_lea.sflag (!%p299_p10), [#allocation4], %s344_s30 }
  0x14   : > { %v1075_v0 = vld [vmem:[%s1461_s4 + $0x38] sm:$0xff]   ;;  %v1181_v1 = vmov 0.0   ;;  %v1076_v2 = vld [vmem:[%s1461_s4 + $0x30] sm:$0xff]   ;;  %vm1182_vm0 = vmmov 0   ;;  %s348_s19 = scalar_select %p347_p11, %s1171_s27, 1  ;;  %v373_v3 = vlaneseq  ;;  %v1077_v4 = vld [vmem:[%s1461_s4 + $0x28] sm:$0xff]  }
  0x15   : > { %958 = vmatprep.subr.bf16.mxu0 %v1181_v1  ;;  %978 = vmatprep.subr.bf16.mxu1 %v1181_v1  ;;  %v1078_v5 = vld [vmem:[%s1461_s4 + $0x20] sm:$0xff]   ;;  %v1079_v9 = vld [vmem:[%s1461_s4 + $0x18] sm:$0xff]   ;;  %v1080_v14 = vld [vmem:[%s1461_s4 + $0x10] sm:$0xff]  }
  0x16   : > { %959 = vmatpush3.bf16.msra.mxu0 %v1075_v0  ;;  %974 = vmatprep.mubr.msk.bf16.mxu0 %vm1182_vm0, %v1181_v1  ;;  %s900_s22 = sshll.u32 %s348_s19, 3  ;;  %v374_v6 = vshrl.u32 %v373_v3, 7  ;;  %v386_v7 = vld [vmem:[%s1459_s2] sm:$0x1]  ;;  %v1091_v18 = vld [vmem:[%s1462_s5 + $0x38] sm:$0xff]   ;;  %v1092_v19 = vld [vmem:[%s1462_s5 + $0x30] sm:$0xff]  }
  0x17   : > { %960 = vmatprep.subr.bf16.mxu0 %v1181_v1  ;;  %994 = vmatprep.mubr.msk.bf16.mxu1 %vm1182_vm0, %v1181_v1  ;;  %s353_s8 = scalar_lea.vmem %s1457_s0, %s900_s22  ;;  %s359_s22 = scalar_lea.vmem %s1458_s1, %s348_s19  ;;  %v394_v11 = vsub.f32 1.0, %v386_v7  ;;  %v1081_v22 = vld [vmem:[%s1461_s4 + $0x8] sm:$0xff]   ;;  %v1082_v25 = vld [vmem:[%s1461_s4] sm:$0xff]   ;;  %v1083_v28 = vld [vmem:[%s1463_s6 + $0x38] sm:$0xff]  }
  0x18   : > { %v1308_v8 = vld [vmem:[%s353_s8] sm:$0xff]  ;;  %v1316_v10 = vsub.s32 0, %v374_v6  ;;  %vm375_vm1 = vcmp.eq.s32.totalorder %v374_v6, 0  ;;  %979 = vmatpush3.bf16.msra.mxu1 %v1091_v18  ;;  %v1093_v23 = vld [vmem:[%s1462_s5 + $0x28] sm:$0xff]   ;;  %v1095_v29 = vld [vmem:[%s1462_s5 + $0x18] sm:$0xff]   ;;  %s899_s19 = sshll.u32 %s344_s30, 3 }
  0x19   : > { %v372_v12 = vrot.slane %v1308_v8, 7  ;;  %v901_v13 = vld [vmem:[%s359_s22] ss:$0 sm:$0xff]  ;;  %980 = vmatprep.subr.bf16.mxu1 %v1181_v1  ;;  %v1084_v30 = vld [vmem:[%s1463_s6 + $0x30] sm:$0xff]   ;;  %v1085_v32 = vld [vmem:[%s1463_s6 + $0x28] sm:$0xff]   ;;  %s928_s8 = sshll.u32 %s1171_s27, 7 }
  0x1a   : > { %961 = vmatpush3.bf16.msra.mxu0 %v1076_v2  ;;  %v391_v15 = vrot.slane %v386_v7, %v1316_v10  ;;  %v399_v16 = vrot.slane %v394_v11, %v1316_v10  ;;  %v1094_v26 = vld [vmem:[%s1462_s5 + $0x20] sm:$0xff]   ;;  %v1096_v31 = vld [vmem:[%s1462_s5 + $0x10] sm:$0xff]   ;;  %v1087_v36 = vld [vmem:[%s1463_s6 + $0x18] sm:$0xff]   ;;  %s346_s10 = scalar_lea.vmem [#allocation3], %s899_s19  ;;  %s1411_s17 = scalar_lea.hbm %s1464_s7, %s928_s8 }
  0x1b   : > { %962 = vmatprep.subr.bf16.mxu0 %v1181_v1  ;;  %v385_v17 = vsel %vm375_vm1, %v901_v13, %v372_v12  ;;  %v630_v33 = vld [vmem:[%s1460_s3] sm:$0x1]  ;;  %v1088_v39 = vld [vmem:[%s1463_s6 + $0x10] sm:$0xff]   ;;  %v1089_v42 = vld [vmem:[%s1463_s6 + $0x8] sm:$0xff]   ;;  %s776_s12 = sshll.u32 %s346_s10, 4  ;;  %s1183_s27 = smov [#allocation3]   ;;  %s1413_s12 = int_to_ptr.vmem [resolvable:$true] %s776_s12 }
  0x1c   : > { %v393_v20 = vmul.f32 %v391_v15, %v1308_v8  ;;  %v401_v21 = vmul.f32 %v399_v16, %v385_v17  ;;  %981 = vmatpush3.bf16.msra.mxu1 %v1092_v19  ;;  %v1086_v34 = vld [vmem:[%s1463_s6 + $0x20] sm:$0xff]   ;;  %v638_v35 = vsub.f32 1.0, %v630_v33  ;;  %v635_v38 = vrot.slane %v630_v33, %v1316_v10  ;;  %v1097_v46 = vld [vmem:[%s1462_s5 + $0x8] sm:$0xff]   ;;  %s1103_s20 = scalar_lea.vmem %s1413_s12, 128  ;;  %s1107_s21 = sshll.u32 %s1183_s27, 4  ;;  %s1108_s21 = int_to_ptr.vmem [resolvable:$false] %s1107_s21 }
  0x1d   : > { %982 = vmatprep.subr.bf16.mxu1 %v1181_v1  ;;  %v1090_v44 = vld [vmem:[%s1463_s6] sm:$0xff]   ;;  %p1104_p12 = scmp.ne.s32.totalorder %s1413_s12, %s1103_s20  ;;  %s1109_s22 = scalar_lea.vmem %s1108_s21, 256 }
  0x1e   : > { %963 = vmatpush3.bf16.msra.mxu0 %v1077_v4  ;;  %v402_v24 = vadd.f32 %v401_v21, %v393_v20  ;;  %v643_v37 = vrot.slane %v638_v35, %v1316_v10  ;;  %v637_v41 = vmul.f32 %v635_v38, %v1308_v8  ;;  %v1098_v47 = vld [vmem:[%s1462_s5] sm:$0xff]   ;;  %p1110_p1 = scmp.lt.s32.totalorder %s1413_s12, %s1108_s21  ;;  %p1111_p2 = scmp.lt.s32.totalorder %s1109_s22, %s1103_s20 }
  0x1f   : > { %964 = vmatprep.subr.bf16.mxu0 %v1181_v1  ;;  %p1105_p13 = pnand %p1104_p12, %p1264_p4 }
  0x20   : > { %983 = vmatpush3.bf16.msra.mxu1 %v1093_v23  ;;  %v403_v27 = vpack.c.bf16 %v402_v24, %v402_v24  ;;  %v645_v40 = vmul.f32 %v643_v37, %v385_v17  ;;  %p1112_p3 = por %p1111_p2, %p1110_p1 }
  0x21   : > { %984 = vmatprep.subr.bf16.mxu1 %v1181_v1  ;;  %p1106_p0 = pneg %p1105_p13 }
  0x22   : > { %965 = vmatpush3.bf16.msra.mxu0 %v1078_v5  ;;  %v646_v43 = vadd.f32 %v645_v40, %v637_v41 }
  0x23   : > { %966 = vmatprep.subr.bf16.mxu0 %v1181_v1  ;;  %p1113_p5 = pnand %p1112_p3, %p1106_p0 }
  0x24   : > { %985 = vmatpush3.bf16.msra.mxu1 %v1094_v26  ;;  %v647_v45 = vpack.c.bf16 %v646_v43, %v646_v43 }
  0x25   : > { %986 = vmatprep.subr.bf16.mxu1 %v1181_v1 }
  0x26   : > { %967 = vmatpush3.bf16.msra.mxu0 %v1079_v9 }
  0x27   : > { %968 = vmatprep.subr.bf16.mxu0 %v1181_v1 }
  0x28   : > { %987 = vmatpush3.bf16.msra.mxu1 %v1095_v29 }
  0x29   : > { %988 = vmatprep.subr.bf16.mxu1 %v1181_v1 }
  0x2a   : > { %969 = vmatpush3.bf16.msra.mxu0 %v1080_v14 }
  0x2b   : > { %970 = vmatprep.subr.bf16.mxu0 %v1181_v1 }
  0x2c   : > { %989 = vmatpush3.bf16.msra.mxu1 %v1096_v31 }
  0x2d   : > { %990 = vmatprep.subr.bf16.mxu1 %v1181_v1 }
  0x2e   : > { %971 = vmatpush3.bf16.msra.mxu0 %v1081_v22 }
  0x2f   : > { %972 = vmatprep.subr.bf16.mxu0 %v1181_v1 }
  0x30   : > { %991 = vmatpush3.bf16.msra.mxu1 %v1097_v46 }
  0x31   : > { %992 = vmatprep.subr.bf16.mxu1 %v1181_v1 }
  0x32   : > { %973 = vmatpush3.bf16.msra.mxu0 %v1082_v25 }
  0x33   : > { %998 = vmatprep.subr.bf16.mxu0 %v1181_v1 }
  0x34   : > { %993 = vmatpush3.bf16.msra.mxu1 %v1098_v47 }
  0x35   : > { %975 = vmatmul.mubr.bf16.vlgmr.msra.gmra.mxu0 %v403_v27 }
  0x36   : > { %999 = vmatpush3.bf16.msra.mxu0 %v1083_v28  ;;  %1014 = vmatprep.mubr.msk.bf16.mxu0 %vm1182_vm0, %v1181_v1 }
  0x37   : > { %1000 = vmatprep.subr.bf16.mxu0 %v1181_v1 }
  0x3a   : > { %1001 = vmatpush3.bf16.msra.mxu0 %v1084_v30 }
  0x3b   : > { %1002 = vmatprep.subr.bf16.mxu0 %v1181_v1 }
  0x3e   : > { %1003 = vmatpush3.bf16.msra.mxu0 %v1085_v32 }
  0x3f   : > { %1004 = vmatprep.subr.bf16.mxu0 %v1181_v1 }
  0x42   : > { %1005 = vmatpush3.bf16.msra.mxu0 %v1086_v34 }
  0x43   : > { %1006 = vmatprep.subr.bf16.mxu0 %v1181_v1 }
  0x46   : > { %1007 = vmatpush3.bf16.msra.mxu0 %v1087_v36 }
  0x47   : > { %1008 = vmatprep.subr.bf16.mxu0 %v1181_v1 }
  0x4a   : > { %1009 = vmatpush3.bf16.msra.mxu0 %v1088_v39 }
  0x4b   : > { %1010 = vmatprep.subr.bf16.mxu0 %v1181_v1 }
  0x4e   : > { %1011 = vmatpush3.bf16.msra.mxu0 %v1089_v42 }
  0x4f   : > { %1012 = vmatprep.subr.bf16.mxu0 %v1181_v1 }
  0x52   : > { %1013 = vmatpush3.bf16.msra.mxu0 %v1090_v44 }
  0x55   : > { %1015 = vmatmul.mubr.bf16.vlgmr.msra.gmra.mxu0 %v647_v45 }
  0xf5   : > { %v502_v48 = vpop.f32.mrf.mxu0 }
  0xf6   : > { %v508_v49 = vmax.f32 %v502_v48, 0.0 }
  0xf7   : > { %v976_v50 = vpop.f32.mrf.mxu0 }
  0xf8   : > { %v509_v51 = vmul.f32 %v508_v49, %v508_v49 }
  0xf9   : > { %v505_v52 = vpop.f32.mrf.mxu0 }
  0xfa   : > { %v510_v53 = vpack.c.bf16 %v509_v51, %v509_v51 }
  0xfb   : > { %v977_v54 = vpop.f32.mrf.mxu0 }
  0xfc   : > { %995 = vmatmul.mubr.bf16.vlgmr.msra.gmra.mxu1 %v510_v53 }
 0x115   : > { %v746_v55 = vpop.f32.mrf.mxu0 }
 0x116   : > { %v926_v59 = vmul.f32 -1.442695, %v746_v55 }
 0x117   : > { %v1016_v56 = vpop.f32.mrf.mxu0 }
 0x118   : > { %1099 = vpow2.f32 %v926_v59 }
 0x119   : > { %v749_v57 = vpop.f32.mrf.mxu0 }
 0x11b   : > { %v1017_v58 = vpop.f32.mrf.mxu0 }
 0x125   : > { %v1100_v60 = vpop.eup %1099 }
 0x126   : > { %v755_v61 = vadd.f32 1.0, %v1100_v60 }
 0x128   : > { %1101 = vrcp.f32 %v755_v61 }
 0x135   : > { %v1102_v62 = vpop.eup %1101 }
 0x1bc   : > { %v609_v63 = vpop.f32.mrf.mxu1 }
 0x1bd   : > { %v759_v0 = vmul.f32 %v1102_v62, %v609_v63 }
 0x1be   : > { %v996_v1 = vpop.f32.mrf.mxu1 }
 0x1bf   : > { %760 = vst [vmem:[%s346_s10] sm:$0xff] %v759_v0 }
 0x1c0   : > { %v612_v2 = vpop.f32.mrf.mxu1 }
 0x1c1   : > { %1116 = shalt.err (!%p1113_p5)
}
 0x1c2   : > { %s1117_s23 = scalar_lea.hbm %s1411_s17, 128  ;;  %s1121_s8 = scalar_lea.hbm %s1464_s7, 256 }
 0x1c3   : > { %p1118_p6 = scmp.ne.s32.totalorder %s1411_s17, %s1117_s23  ;;  %p1122_p10 = scmp.lt.s32.totalorder %s1411_s17, %s1464_s7 }
 0x1c4   : > { %p1123_p11 = scmp.lt.s32.totalorder %s1121_s8, %s1117_s23 }
 0x1c5   : > { %p1119_p7 = pnand %p1118_p6, %p1264_p4 }
 0x1c6   : > { %p1124_p12 = por %p1123_p11, %p1122_p10 }
 0x1c7   : > { %p1120_p9 = pneg %p1119_p7 }
 0x1c9   : > { %p1125_p13 = pnand %p1124_p12, %p1120_p9 }
 0x1cb   : > { %1128 = shalt.err (!%p1125_p13)
}
 0x1cc   : > { %1018 = dma.vmem_to_hbm [thread:$0]  (%p1264_p4), %s1413_s12, 128, %s1411_s17, %s762_s18   ;;  %v997_v3 = vpop.f32.mrf.mxu1 }
 0x1cd PF: > { %p1024_p0 = scmp.ge.s32.totalorder %s1179_s29, 2  ;;  %s788_s16 = sand.u32 1, %s1159_s24  }
 0x1ce   : > { %s789_s20 = scalar_lea.sflag [#allocation4], %s788_s16 }
 0x1cf   : > { %p1021_p1 = pnand %p1024_p0, %p1271_p8 }
 0x1d1   : > { %p1022_p2 = pneg %p1021_p1 }
 0x1d3   : > { %1154 = dma.done.wait (%p1022_p2), %s789_s20, 128  }
 0x1d4   : > { %1156 = vsyncadd (%p1022_p2), %s789_s20, 4294967168  ;;  %s20_s29 = sadd.s32 1, %s1179_s29   ;;  %s1467_s24 = smov %s1163_s25 }
 0x1d5   : > { %p17_p3 = scmp.ge.s32.totalorder %s20_s29, 4   ;;  %s1468_s25 = smov %s1167_s26 }
 0x1d6   : > { %s1469_s26 = smov %s1277_s14  ;;  %s1470_s27 = smov %s1175_s28 }
 0x1d7   : > { %s1471_s28 = smov %s1473_s9  ;;  %19 = sbr.rel (!%p17_p3) target bundleno = 4 (0x4), region = 104 }
 0x1dc   :  { %794 = vsyncpa [#allocation4], 1 }
 0x1dd   :  { %796 = vsyncpa [#allocation4 + $0x1], 1 }

</bundles_post_ra>
